<compile_context>
chip_gen: v5e
topology: v5e:2x2
jax: 0.10.0
libtpu: 0.0.40
codegen_flags: <defaults>
</compile_context>

<pallas_src>
import jax
import jax.numpy as jnp
from jax.experimental import pallas as pl
from jax.experimental.pallas import tpu as pltpu


def _hswish_kernel(x_ref, o_ref):
    x = x_ref[...]
    # relu6(x + 3) = clamp(x + 3, 0, 6); pure VPU elementwise work.
    # Computed in the input dtype (weak-typed constants), matching PyTorch's
    # half-precision hardswish behavior for bf16/f16 inputs.
    o_ref[...] = (x * jnp.clip(x + 3.0, 0.0, 6.0) * (1.0 / 6.0)).astype(o_ref.dtype)


_LANE = 128
_WIDTH = 1024  # 8 * 128: lane-dense row width for the aligned 2-D path


def _target_block_bytes() -> int:
    """Per-generation block-size target (amortize ~0.35us/step vs HBM BW)."""
    try:
        kind = jax.devices()[0].device_kind.lower()
    except Exception:  # pragma: no cover - interpret/CPU fallback
        kind = ""
    if "v5" in kind:      # ~0.8 TB/s HBM: 2 MiB blocks already <7% step overhead
        return 2 << 20
    if "v6" in kind:      # ~1.4 TB/s: returns flat beyond ~4 MiB
        return 4 << 20
    return 8 << 20        # v7x (~3.2 TB/s per TC) and newer/unknown chips


def hswish(x: jax.Array, *, inplace: bool = False,
           block_bytes: int | None = None) -> jax.Array:
    """Hard-swish y = x * relu6(x + 3) / 6, computed in a Pallas TPU kernel."""
    if not jnp.issubdtype(x.dtype, jnp.floating):
        raise TypeError(f"hswish expects a floating dtype, got {x.dtype}")

    orig_shape = x.shape
    dtype = x.dtype
    itemsize = jnp.dtype(dtype).itemsize
    n = x.size
    if n == 0:
        return x

    if block_bytes is None:
        block_bytes = _target_block_bytes()

    # Native sublane packing: 8 rows (f32), 16 (bf16/f16), 32 (8-bit floats).
    packing = max(8, 32 // itemsize)
    granule = packing * _LANE  # one vreg's worth of elements for this dtype
    block_elems = max(granule, (block_bytes // itemsize) // granule * granule)

    flat = x.reshape(-1)  # contiguous reshape: free

    if n % _WIDTH == 0:
        # Aligned path: lane-dense (rows, 1024) slab, zero extra HBM traffic.
        rows = n // _WIDTH
        tile_rows = max(packing, (block_elems // _WIDTH) // packing * packing)
        if rows <= tile_rows:
            tile_rows = rows  # single block == full array dims
        arr = flat.reshape(rows, _WIDTH)
        block_shape = (tile_rows, _WIDTH)
        grid = (pl.cdiv(rows, tile_rows),)
        index_map = lambda i: (i, 0)
    else:
        # Misaligned path: run directly over the flat 1-D array — no pad, no
        # tail slice.  Block is either the full length (always legal) or a
        # multiple of `granule`; Pallas masks the partial trailing block.
        blk = n if n <= block_elems else block_elems
        arr = flat
        block_shape = (blk,)
        grid = (pl.cdiv(n, blk),)
        index_map = lambda i: (i,)

    # Double-buffered input + output = 4x block; keep headroom, never below the
    # smallest scoped default (16 MiB on v5e) and under v7x's 64 MiB physical.
    vmem_limit = max(16 << 20, min(4 * block_bytes + (8 << 20), 48 << 20))

    call_kwargs = {}
    if inplace:
        # Mirrors PyTorch inplace=True: alias input 0 to output 0.  XLA inserts
        # a defensive copy unless the caller donates x; DMA traffic unchanged.
        call_kwargs["input_output_aliases"] = {0: 0}

    out = pl.pallas_call(
        _hswish_kernel,
        out_shape=jax.ShapeDtypeStruct(arr.shape, dtype),
        grid_spec=pltpu.PrefetchScalarGridSpec(
            num_scalar_prefetch=0,
            grid=grid,
            in_specs=[pl.BlockSpec(block_shape, index_map)],
            out_specs=pl.BlockSpec(block_shape, index_map),
        ),
        compiler_params=pltpu.CompilerParams(
            dimension_semantics=("parallel",),  # v7x: shard grid over both TCs
            vmem_limit_bytes=vmem_limit,
        ),
        cost_estimate=pl.CostEstimate(
            flops=5 * n, transcendentals=0, bytes_accessed=2 * n * itemsize
        ),
        **call_kwargs,
    )(arr)

    return out.reshape(orig_shape)  # contiguous reshape: free


def _hswish_ref(x):
    return x * jnp.clip(x + 3.0, 0.0, 6.0) * (1.0 / 6.0)


if __name__ == "__main__":
    keys = jax.random.split(jax.random.PRNGKey(0), 6)

    # 1. Primary NCHW case (matches the PyTorch module usage): aligned path.
    x = jax.random.normal(keys[0], (2, 4, 16, 16), jnp.float32) * 4.0
    y = hswish(x)
    jax.block_until_ready(y)
    assert y.shape == x.shape and y.dtype == x.dtype
    assert jnp.allclose(y, _hswish_ref(x), atol=1e-6, rtol=1e-6)

    # 2. Misaligned size (n % 1024 != 0): pad-free 1-D path, single block.
    x2 = jax.random.normal(keys[1], (3, 5, 7, 11), jnp.float32) * 4.0
    y2 = hswish(x2)
    jax.block_until_ready(y2)
    assert y2.shape == x2.shape
    assert jnp.allclose(y2, _hswish_ref(x2), atol=1e-6, rtol=1e-6)

    # 3. Multi-block 2-D grid with a partial trailing block (forced 1 MiB tiles:
    #    600 rows in 256-row tiles -> grid of 3, last block masked).
    x3 = jax.random.normal(keys[2], (1, 6, 400, 256), jnp.float32) * 4.0
    y3 = hswish(x3, block_bytes=1 << 20)
    jax.block_until_ready(y3)
    assert jnp.allclose(y3, _hswish_ref(x3), atol=1e-6, rtol=1e-6)

    # 4. Multi-block 1-D grid with a misaligned trailing block (forced 32 KiB
    #    tiles: 13923 elems in 8192-elem blocks -> grid of 2, tail masked).
    x4 = jax.random.normal(keys[3], (7, 9, 13, 17), jnp.float32) * 4.0
    y4 = hswish(x4, block_bytes=32 << 10)
    jax.block_until_ready(y4)
    assert jnp.allclose(y4, _hswish_ref(x4), atol=1e-6, rtol=1e-6)

    # 5. inplace=True (input_output_aliases), mirroring PyTorch's inplace flag.
    x5 = jax.random.normal(keys[4], (2, 4, 16, 16), jnp.float32) * 4.0
    y5 = hswish(x5, inplace=True)
    jax.block_until_ready(y5)
    assert jnp.allclose(y5, _hswish_ref(x5), atol=1e-6, rtol=1e-6)

    # 6. bf16 input: computed in input dtype (matches PyTorch half hardswish).
    x6 = (jax.random.normal(keys[5], (2, 4, 16, 16), jnp.float32) * 4.0).astype(jnp.bfloat16)
    y6 = hswish(x6)
    jax.block_until_ready(y6)
    assert y6.dtype == jnp.bfloat16
    assert jnp.allclose(y6.astype(jnp.float32),
                        _hswish_ref(x6.astype(jnp.float32)),
                        atol=5e-2, rtol=5e-2)

    print("KERNEL_OK")
</pallas_src>

<mosaic_0001>
module attributes {stable_mosaic.version = 11 : i64} {
  func.func @_hswish_kernel(%arg0: i32, %arg1: memref<2x1024xf32, #tpu.memory_space<vmem>>, %arg2: memref<2x1024xf32, #tpu.memory_space<vmem>>) attributes {dimension_semantics = [#tpu.dimension_semantics<parallel>], iteration_bounds = array<i64: 1>, scalar_prefetch = 0 : i64, scratch_operands = 0 : i64, tpu.core_type = #tpu.core_type<tc>, window_params = [{transform_indices = @transform_0, window_bounds = array<i64: 2, 1024>}, {transform_indices = @transform_1, window_bounds = array<i64: 2, 1024>}]} {
    %c0 = arith.constant 0 : index
    %c0_0 = arith.constant 0 : index
    %0 = vector.load %arg1[%c0, %c0_0] : memref<2x1024xf32, #tpu.memory_space<vmem>>, vector<2x1024xf32>
    %cst = arith.constant 3.000000e+00 : f32
    %1 = vector.broadcast %cst : f32 to vector<2x1024xf32>
    %2 = arith.addf %0, %1 : vector<2x1024xf32>
    %cst_1 = arith.constant 0.000000e+00 : f32
    %cst_2 = arith.constant 6.000000e+00 : f32
    %3 = vector.broadcast %cst_1 : f32 to vector<2x1024xf32>
    %4 = arith.maximumf %3, %2 : vector<2x1024xf32>
    %5 = vector.broadcast %cst_2 : f32 to vector<2x1024xf32>
    %6 = arith.minimumf %5, %4 : vector<2x1024xf32>
    %7 = arith.mulf %0, %6 : vector<2x1024xf32>
    %cst_3 = arith.constant 0.166666672 : f32
    %8 = vector.broadcast %cst_3 : f32 to vector<2x1024xf32>
    %9 = arith.mulf %7, %8 : vector<2x1024xf32>
    %c0_4 = arith.constant 0 : index
    %c0_5 = arith.constant 0 : index
    %10 = vector.load %arg2[%c0_4, %c0_5] : memref<2x1024xf32, #tpu.memory_space<vmem>>, vector<2x1024xf32>
    tpu.vector_store %arg2[%c0_4, %c0_5], %9 {strides = array<i32>} : memref<2x1024xf32, #tpu.memory_space<vmem>>, vector<2x1024xf32>,
    return
  }
  func.func @transform_0(%arg0: i32) -> (i32, i32) {
    %c0_i32 = arith.constant 0 : i32
    %c0_i32_0 = arith.constant 0 : i32
    return %arg0, %c0_i32 : i32, i32
  }
  func.func @transform_1(%arg0: i32) -> (i32, i32) {
    %c0_i32 = arith.constant 0 : i32
    %c0_i32_0 = arith.constant 0 : i32
    return %arg0, %c0_i32 : i32, i32
  }
}

</mosaic_0001>

<bundles_post_ra>
// kernel: tpu_custom_call.1
= control target key start
LH: loop header
LB: loop body
LE: loop exit
PB: predicated region body
PF: predicated region fallthrough
CT: control target
= control target key end

     0   :  { %6 = vsyncpa [#allocation3], 0  ;;  %s126_s0 = inlined_call_operand.hbm [shape: f32[2,1024], index: 0, kind: input, shape index: {}]   ;;  %s127_s1 = inlined_call_operand.hbm [shape: f32[2,1024], index: 1, kind: output, shape index: {}]  }
   0x1   :  { %7 = vsyncpa [#allocation4], 0  ;;  %s13_s8 = sshll.u32 %s126_s0, 4  ;;  %s108_s9 = smov [#allocation2]   ;;  %s14_s8 = int_to_ptr.hbm [resolvable:$true] %s13_s8 }
   0x2   :  { %s15_s10 = sshll.u32 %s108_s9, 4  ;;  %s16_s10 = int_to_ptr.vmem [resolvable:$true] %s15_s10 }
   0x3   :  { %18 = dma.hbm_to_vmem [thread:$0]  %s14_s8, 256, %s16_s10, [#allocation3]  }
   0x4   :  { %104 = dma.done.wait [#allocation3], 256  }
   0x5   :  { %105 = vsyncadd [#allocation3], 4294967040  ;;  %v23_v0 = vld [vmem:[#allocation2] sm:$0xff]  ;;  %v24_v1 = vld [vmem:[#allocation2 + $0x8] sm:$0xff]  ;;  %s109_s11 = smov [#allocation5]   ;;  %s44_s14 = sshll.u32 %s127_s1, 4  ;;  %s45_s14 = int_to_ptr.hbm [resolvable:$true] %s44_s14 }
   0x6   :  { %v25_v2 = vadd.f32 3.0, %v23_v0  ;;  %v26_v3 = vadd.f32 3.0, %v24_v1  ;;  %s42_s12 = sshll.u32 %s109_s11, 4  ;;  %s43_s12 = int_to_ptr.vmem [resolvable:$true] %s42_s12 }
   0x8   :  { %v27_v4 = vmax.f32 %v25_v2, 0.0  ;;  %v28_v5 = vmax.f32 %v26_v3, 0.0 }
   0xa   :  { %v29_v6 = vmin.f32 %v27_v4, 6.0  ;;  %v30_v7 = vmin.f32 %v28_v5, 6.0 }
   0xc   :  { %v31_v8 = vmul.f32 %v29_v6, %v23_v0  ;;  %v32_v9 = vmul.f32 %v30_v7, %v24_v1 }
   0xe   :  { %v33_v10 = vmul.f32 0.16666667, %v31_v8  ;;  %v34_v11 = vmul.f32 0.16666667, %v32_v9 }
  0x10   :  { %35 = vst [vmem:[#allocation5] sm:$0xff] %v33_v10 }
  0x11   :  { %36 = vst [vmem:[#allocation5 + $0x8] sm:$0xff] %v34_v11 }
  0x12   :  { %47 = dma.vmem_to_hbm [thread:$0]  %s43_s12, 256, %s45_s14, [#allocation4]  }
  0x13   :  { %106 = dma.done.wait [#allocation4], 256  }
  0x14   :  { %107 = vsyncadd [#allocation4], 4294967040 }
  0x15   :  { %52 = vsyncpa [#allocation3], 1 }
  0x16   :  { %53 = vsyncpa [#allocation4], 1 }

</bundles_post_ra>
